<compile_context>
chip_gen: v7x
topology: tpu7x:2x2x1
jax: 0.10.0
libtpu: 0.0.40
codegen_flags: <defaults>
</compile_context>

<pallas_src>
import math
import jax
import jax.numpy as jnp
from jax.experimental import pallas as pl
from jax.experimental.pallas import tpu as pltpu

# ----------------------------- config ---------------------------------------
VOCAB    = 512
D_EMBED  = 64
SEQ      = 16
N_HEADS  = 4
N_LAYERS = 12
D_HEAD   = D_EMBED // N_HEADS
EPS      = 1e-5            # PyTorch nn.LayerNorm default
BATCH    = 2
NEG_BIAS = -1e30           # additive causal-mask bias


def _layernorm(x, gamma, beta):
    mean = jnp.mean(x, axis=-1, keepdims=True)
    var = jnp.mean((x - mean) ** 2, axis=-1, keepdims=True)
    return (x - mean) / jnp.sqrt(var + EPS) * gamma + beta


# ----------------------- embedding kernel (VMEM row gather) ------------------
def _embedding_kernel(tok_ref, emb_ref, pos_ref, o_ref):
    b = pl.program_id(0)
    # Token ids come from SMEM (scalar prefetch); rows are gathered straight
    # out of the VMEM-resident table with dynamic-slice loads (no DMAs).
    rows = [emb_ref[pl.ds(tok_ref[b, s], 1), :] for s in range(SEQ)]
    o_ref[0] = jnp.concatenate(rows, axis=0) + pos_ref[...]


def clip_embedding(tokens, emb_table, pos_emb):
    b = tokens.shape[0]
    grid_spec = pltpu.PrefetchScalarGridSpec(
        num_scalar_prefetch=1,                                    # tokens -> SMEM
        grid=(b,),
        in_specs=[
            # 512x64 f32 = 128 KiB: whole table fits comfortably in VMEM.
            # TODO(synk): at real CLIP size (49408x768) keep the table in HBM
            # (memory_space=pl.ANY) and issue all B*S row-gather DMAs in
            # flight before the first wait.
            pl.BlockSpec((VOCAB, D_EMBED), lambda i, tok: (0, 0)),
            pl.BlockSpec((SEQ, D_EMBED), lambda i, tok: (0, 0)),
        ],
        out_specs=pl.BlockSpec((1, SEQ, D_EMBED), lambda i, tok: (i, 0, 0)),
    )
    return pl.pallas_call(
        _embedding_kernel,
        grid_spec=grid_spec,
        out_shape=jax.ShapeDtypeStruct((b, SEQ, D_EMBED), jnp.float32),
        compiler_params=pltpu.CompilerParams(dimension_semantics=("parallel",)),
    )(tokens, emb_table, pos_emb)


# ------------------ fused transformer stack (+ final LN) kernel --------------
def _fused_layers_kernel(x_ref, mask_ref,
                         ln1_g_ref, ln1_b_ref, w_qkv_ref, b_qkv_ref,
                         w_out_ref, b_out_ref, ln2_g_ref, ln2_b_ref,
                         w1_ref, b1_ref, w2_ref, b2_ref,
                         fg_ref, fb_ref,
                         o_ref, state_ref):
    layer = pl.program_id(1)
    n_layers = pl.num_programs(1)

    # The activation of this batch element is carried in VMEM scratch across
    # the sequential layer axis; (re)initialize at layer 0 of each batch.
    @pl.when(layer == 0)
    def _():
        state_ref[...] = x_ref[0]

    x = state_ref[...]                                  # (S, D) f32
    mask = mask_ref[...]                                # (S, S) additive bias

    # ---- self-attention block ----------------------------------------------
    h = _layernorm(x, ln1_g_ref[0, 0], ln1_b_ref[0, 0])
    qkv = jnp.dot(h.astype(jnp.bfloat16), w_qkv_ref[0],
                  preferred_element_type=jnp.float32) + b_qkv_ref[0, 0]   # (S,3D)

    scale = 1.0 / math.sqrt(D_HEAD)
    q = (qkv[:, 0 * D_EMBED:1 * D_EMBED] * scale).reshape(SEQ, N_HEADS, D_HEAD)
    k = qkv[:, 1 * D_EMBED:2 * D_EMBED].reshape(SEQ, N_HEADS, D_HEAD)
    v = qkv[:, 2 * D_EMBED:3 * D_EMBED].reshape(SEQ, N_HEADS, D_HEAD)
    # One head-batched contraction pair per step; no per-batch python loop
    # (batch is a grid axis).
    q = q.transpose(1, 0, 2).astype(jnp.bfloat16)       # (H, S, Dh)
    k = k.transpose(1, 0, 2).astype(jnp.bfloat16)
    v = v.transpose(1, 0, 2).astype(jnp.bfloat16)

    scores = jnp.einsum('hqd,hkd->hqk', q, k,
                        preferred_element_type=jnp.float32)              # (H,S,S)
    scores = scores + mask[None, :, :]
    scores = scores - jnp.max(scores, axis=-1, keepdims=True)
    p = jnp.exp(scores)
    p = p / jnp.sum(p, axis=-1, keepdims=True)          # exact divide (parity)
    ctx = jnp.einsum('hqk,hkd->hqd', p.astype(jnp.bfloat16), v,
                     preferred_element_type=jnp.float32)                 # (H,S,Dh)
    ctx = ctx.transpose(1, 0, 2).reshape(SEQ, D_EMBED)  # (S, D) value, no scratch

    attn = jnp.dot(ctx.astype(jnp.bfloat16), w_out_ref[0],
                   preferred_element_type=jnp.float32) + b_out_ref[0, 0]
    x = x + attn                                        # residual

    # ---- MLP block (quick-GELU) ---------------------------------------------
    h = _layernorm(x, ln2_g_ref[0, 0], ln2_b_ref[0, 0])
    m = jnp.dot(h.astype(jnp.bfloat16), w1_ref[0],
                preferred_element_type=jnp.float32) + b1_ref[0, 0]
    m = m * jax.nn.sigmoid(1.702 * m)
    m = jnp.dot(m.astype(jnp.bfloat16), w2_ref[0],
                preferred_element_type=jnp.float32) + b2_ref[0, 0]
    x = x + m                                           # residual

    # Exactly one full-tile store per step: carried state on non-final layers,
    # the final-LayerNorm result into the output block on the last layer only.
    @pl.when(layer != n_layers - 1)
    def _():
        state_ref[...] = x

    @pl.when(layer == n_layers - 1)
    def _():
        o_ref[0] = _layernorm(x, fg_ref[0], fb_ref[0])


def clip_layers(x, mask_bias, layer_stack, final_gamma, final_beta):
    bsz, seq, d = x.shape

    def stacked_spec(arr):
        tail = arr.shape[1:]
        return pl.BlockSpec((1,) + tail,
                            lambda b, l, _nt=len(tail): (l,) + (0,) * _nt)

    in_specs = (
        [pl.BlockSpec((1, seq, d), lambda b, l: (b, 0, 0)),     # activation
         pl.BlockSpec((seq, seq), lambda b, l: (0, 0))]         # causal bias
        + [stacked_spec(a) for a in layer_stack]                # streamed weights
        + [pl.BlockSpec(final_gamma.shape, lambda b, l: (0, 0)),
           pl.BlockSpec(final_beta.shape, lambda b, l: (0, 0))])

    # Advisory cost estimate so XLA schedules the custom call sensibly.
    matmul_flops = 2 * bsz * seq * d * (3 * d + d + 4 * d + 4 * d)
    attn_flops = 4 * bsz * N_HEADS * seq * seq * D_HEAD
    flops = N_LAYERS * (matmul_flops + attn_flops)
    transcendentals = N_LAYERS * (bsz * N_HEADS * seq * seq + bsz * seq * 4 * d)
    bytes_accessed = (bsz * sum(int(a.size) * a.dtype.itemsize for a in layer_stack)
                      + 2 * int(x.size) * 4 + int(mask_bias.size) * 4
                      + int(final_gamma.size) * 4 + int(final_beta.size) * 4)

    grid_spec = pltpu.PrefetchScalarGridSpec(
        num_scalar_prefetch=0,
        grid=(bsz, N_LAYERS),
        in_specs=in_specs,
        out_specs=pl.BlockSpec((1, seq, d), lambda b, l: (b, 0, 0)),
        scratch_shapes=[pltpu.VMEM((seq, d), jnp.float32)],     # carried state
    )
    return pl.pallas_call(
        _fused_layers_kernel,
        grid_spec=grid_spec,
        out_shape=jax.ShapeDtypeStruct((bsz, seq, d), jnp.float32),
        compiler_params=pltpu.CompilerParams(
            # batch axis: megacore-parallel on v7x; layer axis: weight stream.
            dimension_semantics=("parallel", "arbitrary")),
        cost_estimate=pl.CostEstimate(flops=flops,
                                      transcendentals=transcendentals,
                                      bytes_accessed=bytes_accessed),
    )(x, mask_bias, *layer_stack, final_gamma, final_beta)


# ----------------------- parameter init (deterministic) ----------------------
def init_params(key):
    ks = jax.random.split(key, 5)
    emb_table = 0.02 * jax.random.normal(ks[0], (VOCAB, D_EMBED), jnp.float32)
    pos_emb = jnp.zeros((SEQ, D_EMBED), jnp.float32)       # torch.zeros init

    # causal additive bias, computed once for all layers
    row = jnp.arange(SEQ)[:, None]
    col = jnp.arange(SEQ)[None, :]
    mask_bias = jnp.where(col > row, NEG_BIAS, 0.0).astype(jnp.float32)

    s = 0.02
    w_qkv = (s * jax.random.normal(ks[1], (N_LAYERS, D_EMBED, 3 * D_EMBED))).astype(jnp.bfloat16)
    w_out = (s * jax.random.normal(ks[2], (N_LAYERS, D_EMBED, D_EMBED))).astype(jnp.bfloat16)
    w1    = (s * jax.random.normal(ks[3], (N_LAYERS, D_EMBED, 4 * D_EMBED))).astype(jnp.bfloat16)
    w2    = (s * jax.random.normal(ks[4], (N_LAYERS, 4 * D_EMBED, D_EMBED))).astype(jnp.bfloat16)

    ln1_g = jnp.ones((N_LAYERS, 1, D_EMBED), jnp.float32)
    ln1_b = jnp.zeros((N_LAYERS, 1, D_EMBED), jnp.float32)
    ln2_g = jnp.ones((N_LAYERS, 1, D_EMBED), jnp.float32)
    ln2_b = jnp.zeros((N_LAYERS, 1, D_EMBED), jnp.float32)
    b_qkv = jnp.zeros((N_LAYERS, 1, 3 * D_EMBED), jnp.float32)
    b_out = jnp.zeros((N_LAYERS, 1, D_EMBED), jnp.float32)
    b1    = jnp.zeros((N_LAYERS, 1, 4 * D_EMBED), jnp.float32)
    b2    = jnp.zeros((N_LAYERS, 1, D_EMBED), jnp.float32)

    layer_stack = (ln1_g, ln1_b, w_qkv, b_qkv, w_out, b_out,
                   ln2_g, ln2_b, w1, b1, w2, b2)

    final_gamma = jnp.ones((1, D_EMBED), jnp.float32)
    final_beta = jnp.zeros((1, D_EMBED), jnp.float32)
    return emb_table, pos_emb, mask_bias, layer_stack, final_gamma, final_beta


# ----------------------- full model forward ----------------------------------
def clip_forward(tokens, params):
    emb_table, pos_emb, mask_bias, layer_stack, fg, fb = params
    tokens = tokens.astype(jnp.int32)          # tokens.type(torch.long)
    state = clip_embedding(tokens, emb_table, pos_emb)
    return clip_layers(state, mask_bias, layer_stack, fg, fb)


# ----------------------------- main ------------------------------------------
if __name__ == "__main__":
    key = jax.random.PRNGKey(0)
    pkey, tkey = jax.random.split(key)
    params = init_params(pkey)
    tokens = jax.random.randint(tkey, (BATCH, SEQ), 0, VOCAB, dtype=jnp.int32)

    out = clip_forward(tokens, params)
    out = jax.block_until_ready(out)

    assert out.shape == (BATCH, SEQ, D_EMBED), out.shape
    assert out.dtype == jnp.float32
    assert bool(jnp.all(jnp.isfinite(out)))
    print("KERNEL_OK")
</pallas_src>

<mosaic_0001>
module attributes {stable_mosaic.version = 11 : i64} {
  func.func @_embedding_kernel(%arg0: i32, %arg1: memref<2x16xi32, #tpu.memory_space<smem>>, %arg2: memref<512x64xf32, #tpu.memory_space<vmem>>, %arg3: memref<16x64xf32, #tpu.memory_space<vmem>>, %arg4: memref<1x16x64xf32, #tpu.memory_space<vmem>>) attributes {dimension_semantics = [#tpu.dimension_semantics<parallel>], iteration_bounds = array<i64: 2>, scalar_prefetch = 1 : i64, scratch_operands = 0 : i64, tpu.core_type = #tpu.core_type<tc>, window_params = [{pipeline_mode = #tpu.pipeline_mode<synchronous>, transform_indices = @transform_0, window_bounds = array<i64: 512, 64>}, {pipeline_mode = #tpu.pipeline_mode<synchronous>, transform_indices = @transform_1, window_bounds = array<i64: 16, 64>}, {transform_indices = @transform_2, window_bounds = array<i64: 1, 16, 64>}]} {
    %0 = arith.index_cast %arg0 : i32 to index
    %c0 = arith.constant 0 : index
    %1 = memref.load %arg1[%0, %c0] : memref<2x16xi32, #tpu.memory_space<smem>>
    %2 = arith.index_cast %1 : i32 to index
    %c0_0 = arith.constant 0 : index
    %3 = vector.load %arg2[%2, %c0_0] : memref<512x64xf32, #tpu.memory_space<vmem>>, vector<1x64xf32>
    %4 = arith.index_cast %arg0 : i32 to index
    %c1 = arith.constant 1 : index
    %5 = memref.load %arg1[%4, %c1] : memref<2x16xi32, #tpu.memory_space<smem>>
    %6 = arith.index_cast %5 : i32 to index
    %c0_1 = arith.constant 0 : index
    %7 = vector.load %arg2[%6, %c0_1] : memref<512x64xf32, #tpu.memory_space<vmem>>, vector<1x64xf32>
    %8 = arith.index_cast %arg0 : i32 to index
    %c2 = arith.constant 2 : index
    %9 = memref.load %arg1[%8, %c2] : memref<2x16xi32, #tpu.memory_space<smem>>
    %10 = arith.index_cast %9 : i32 to index
    %c0_2 = arith.constant 0 : index
    %11 = vector.load %arg2[%10, %c0_2] : memref<512x64xf32, #tpu.memory_space<vmem>>, vector<1x64xf32>
    %12 = arith.index_cast %arg0 : i32 to index
    %c3 = arith.constant 3 : index
    %13 = memref.load %arg1[%12, %c3] : memref<2x16xi32, #tpu.memory_space<smem>>
    %14 = arith.index_cast %13 : i32 to index
    %c0_3 = arith.constant 0 : index
    %15 = vector.load %arg2[%14, %c0_3] : memref<512x64xf32, #tpu.memory_space<vmem>>, vector<1x64xf32>
    %16 = arith.index_cast %arg0 : i32 to index
    %c4 = arith.constant 4 : index
    %17 = memref.load %arg1[%16, %c4] : memref<2x16xi32, #tpu.memory_space<smem>>
    %18 = arith.index_cast %17 : i32 to index
    %c0_4 = arith.constant 0 : index
    %19 = vector.load %arg2[%18, %c0_4] : memref<512x64xf32, #tpu.memory_space<vmem>>, vector<1x64xf32>
    %20 = arith.index_cast %arg0 : i32 to index
    %c5 = arith.constant 5 : index
    %21 = memref.load %arg1[%20, %c5] : memref<2x16xi32, #tpu.memory_space<smem>>
    %22 = arith.index_cast %21 : i32 to index
    %c0_5 = arith.constant 0 : index
    %23 = vector.load %arg2[%22, %c0_5] : memref<512x64xf32, #tpu.memory_space<vmem>>, vector<1x64xf32>
    %24 = arith.index_cast %arg0 : i32 to index
    %c6 = arith.constant 6 : index
    %25 = memref.load %arg1[%24, %c6] : memref<2x16xi32, #tpu.memory_space<smem>>
    %26 = arith.index_cast %25 : i32 to index
    %c0_6 = arith.constant 0 : index
    %27 = vector.load %arg2[%26, %c0_6] : memref<512x64xf32, #tpu.memory_space<vmem>>, vector<1x64xf32>
    %28 = arith.index_cast %arg0 : i32 to index
    %c7 = arith.constant 7 : index
    %29 = memref.load %arg1[%28, %c7] : memref<2x16xi32, #tpu.memory_space<smem>>
    %30 = arith.index_cast %29 : i32 to index
    %c0_7 = arith.constant 0 : index
    %31 = vector.load %arg2[%30, %c0_7] : memref<512x64xf32, #tpu.memory_space<vmem>>, vector<1x64xf32>
    %32 = arith.index_cast %arg0 : i32 to index
    %c8 = arith.constant 8 : index
    %33 = memref.load %arg1[%32, %c8] : memref<2x16xi32, #tpu.memory_space<smem>>
    %34 = arith.index_cast %33 : i32 to index
    %c0_8 = arith.constant 0 : index
    %35 = vector.load %arg2[%34, %c0_8] : memref<512x64xf32, #tpu.memory_space<vmem>>, vector<1x64xf32>
    %36 = arith.index_cast %arg0 : i32 to index
    %c9 = arith.constant 9 : index
    %37 = memref.load %arg1[%36, %c9] : memref<2x16xi32, #tpu.memory_space<smem>>
    %38 = arith.index_cast %37 : i32 to index
    %c0_9 = arith.constant 0 : index
    %39 = vector.load %arg2[%38, %c0_9] : memref<512x64xf32, #tpu.memory_space<vmem>>, vector<1x64xf32>
    %40 = arith.index_cast %arg0 : i32 to index
    %c10 = arith.constant 10 : index
    %41 = memref.load %arg1[%40, %c10] : memref<2x16xi32, #tpu.memory_space<smem>>
    %42 = arith.index_cast %41 : i32 to index
    %c0_10 = arith.constant 0 : index
    %43 = vector.load %arg2[%42, %c0_10] : memref<512x64xf32, #tpu.memory_space<vmem>>, vector<1x64xf32>
    %44 = arith.index_cast %arg0 : i32 to index
    %c11 = arith.constant 11 : index
    %45 = memref.load %arg1[%44, %c11] : memref<2x16xi32, #tpu.memory_space<smem>>
    %46 = arith.index_cast %45 : i32 to index
    %c0_11 = arith.constant 0 : index
    %47 = vector.load %arg2[%46, %c0_11] : memref<512x64xf32, #tpu.memory_space<vmem>>, vector<1x64xf32>
    %48 = arith.index_cast %arg0 : i32 to index
    %c12 = arith.constant 12 : index
    %49 = memref.load %arg1[%48, %c12] : memref<2x16xi32, #tpu.memory_space<smem>>
    %50 = arith.index_cast %49 : i32 to index
    %c0_12 = arith.constant 0 : index
    %51 = vector.load %arg2[%50, %c0_12] : memref<512x64xf32, #tpu.memory_space<vmem>>, vector<1x64xf32>
    %52 = arith.index_cast %arg0 : i32 to index
    %c13 = arith.constant 13 : index
    %53 = memref.load %arg1[%52, %c13] : memref<2x16xi32, #tpu.memory_space<smem>>
    %54 = arith.index_cast %53 : i32 to index
    %c0_13 = arith.constant 0 : index
    %55 = vector.load %arg2[%54, %c0_13] : memref<512x64xf32, #tpu.memory_space<vmem>>, vector<1x64xf32>
    %56 = arith.index_cast %arg0 : i32 to index
    %c14 = arith.constant 14 : index
    %57 = memref.load %arg1[%56, %c14] : memref<2x16xi32, #tpu.memory_space<smem>>
    %58 = arith.index_cast %57 : i32 to index
    %c0_14 = arith.constant 0 : index
    %59 = vector.load %arg2[%58, %c0_14] : memref<512x64xf32, #tpu.memory_space<vmem>>, vector<1x64xf32>
    %60 = arith.index_cast %arg0 : i32 to index
    %c15 = arith.constant 15 : index
    %61 = memref.load %arg1[%60, %c15] : memref<2x16xi32, #tpu.memory_space<smem>>
    %62 = arith.index_cast %61 : i32 to index
    %c0_15 = arith.constant 0 : index
    %63 = vector.load %arg2[%62, %c0_15] : memref<512x64xf32, #tpu.memory_space<vmem>>, vector<1x64xf32>
    %64 = tpu.concatenate %3, %7, %11, %15, %19, %23, %27, %31, %35, %39, %43, %47, %51, %55, %59, %63 in 0 : vector<1x64xf32>, vector<1x64xf32>, vector<1x64xf32>, vector<1x64xf32>, vector<1x64xf32>, vector<1x64xf32>, vector<1x64xf32>, vector<1x64xf32>, vector<1x64xf32>, vector<1x64xf32>, vector<1x64xf32>, vector<1x64xf32>, vector<1x64xf32>, vector<1x64xf32>, vector<1x64xf32>, vector<1x64xf32> -> vector<16x64xf32>
    %c0_16 = arith.constant 0 : index
    %c0_17 = arith.constant 0 : index
    %65 = vector.load %arg3[%c0_16, %c0_17] : memref<16x64xf32, #tpu.memory_space<vmem>>, vector<16x64xf32>
    %66 = arith.addf %64, %65 : vector<16x64xf32>
    %c0_18 = arith.constant 0 : index
    %c0_19 = arith.constant 0 : index
    %c0_20 = arith.constant 0 : index
    %67 = vector.load %arg4[%c0_18, %c0_19, %c0_20] : memref<1x16x64xf32, #tpu.memory_space<vmem>>, vector<1x16x64xf32>
    %68 = vector.shape_cast %67 : vector<1x16x64xf32> to vector<16x64xf32>
    %69 = vector.shape_cast %66 : vector<16x64xf32> to vector<1x16x64xf32>
    tpu.vector_store %arg4[%c0_18, %c0_19, %c0_20], %69 {strides = array<i32>} : memref<1x16x64xf32, #tpu.memory_space<vmem>>, vector<1x16x64xf32>,
    return
  }
  func.func @transform_0(%arg0: i32, %arg1: memref<2x16xi32, #tpu.memory_space<smem>>) -> (i32, i32) {
    %c0_i32 = arith.constant 0 : i32
    %c0_i32_0 = arith.constant 0 : i32
    %c0_i32_1 = arith.constant 0 : i32
    return %c0_i32, %c0_i32_0 : i32, i32
  }
  func.func @transform_1(%arg0: i32, %arg1: memref<2x16xi32, #tpu.memory_space<smem>>) -> (i32, i32) {
    %c0_i32 = arith.constant 0 : i32
    %c0_i32_0 = arith.constant 0 : i32
    %c0_i32_1 = arith.constant 0 : i32
    return %c0_i32, %c0_i32_0 : i32, i32
  }
  func.func @transform_2(%arg0: i32, %arg1: memref<2x16xi32, #tpu.memory_space<smem>>) -> (i32, i32, i32) {
    %c0_i32 = arith.constant 0 : i32
    %c0_i32_0 = arith.constant 0 : i32
    %c0_i32_1 = arith.constant 0 : i32
    return %arg0, %c0_i32, %c0_i32_0 : i32, i32, i32
  }
}

</mosaic_0001>

<bundles_post_ra>
// kernel: tpu_custom_call.1
= control target key start
LH: loop header
LB: loop body
LE: loop exit
PB: predicated region body
PF: predicated region fallthrough
CT: control target
= control target key end

     0   :  { %s709_s0 = inlined_call_operand.vmem [shape: s32[2,16], index: 0, kind: input, shape index: {}]   ;;  %s710_s1 = inlined_call_operand.vmem [shape: f32[512,64], index: 1, kind: input, shape index: {}]   ;;  %s711_s2 = inlined_call_operand.vmem [shape: f32[16,64], index: 2, kind: input, shape index: {}]   ;;  %s712_s3 = inlined_call_operand.hbm [shape: f32[2,16,64], index: 3, kind: output, shape index: {}]  }
   0x1   :  { %s8_s14 = sshll.u32 %s709_s0, 4  ;;  %s9_s14 = int_to_ptr.vmem [resolvable:$true] %s8_s14 }
   0x2   :  { %s396_s15 = scalar_lea.vmem %s9_s14, 32  ;;  %p401_p1 = scmp.lt.s32.totalorder %s9_s14, %s9_s14 }
   0x3   :  { %p397_p0 = scmp.ne.s32.totalorder %s9_s14, %s396_s15  ;;  %p402_p2 = scmp.lt.s32.totalorder %s396_s15, %s396_s15 }
   0x5   :  { %p403_p3 = por %p402_p2, %p401_p1 }
   0x7   :  { %p404_p4 = pnand %p403_p3, %p397_p0 }
   0x9   :  { %407 = shalt.err (!%p404_p4)  }
   0xa   :  { %s474_s16 = smov [#allocation3]  }
   0xb   :  { %11 = dma.vmem_to_smem %s9_s14, 32, %s474_s16, [#allocation2] }
   0xc   :  { %452 = dma.done.wait [#allocation2], 32 }
   0xd   :  { %453 = vsyncadd [#allocation2], 4294967264 }
   0xe   :  { %13 = sfence }
   0xf   :  { %14 = vsyncpa [#allocation5], 0 }
  0x10   :  { %16 = vsyncpa [#allocation5 + $0x1], 0  ;;  %s501_s17 = smov 0   ;;  %s503_s18 = smov 0  }
  0x11   :  { %s505_s0 = smov 0   ;;  %s507_s19 = smov 0  }
  0x12 LB: > { %717 = sst [smem:[#allocation8_spill]] %s468_s0  ;;  %s522_s20 = sadd.s32 4294967295, %s472_s19   ;;  %s472_s19 = sphi %s507_s19, %s723_s19   ;;  %s468_s0 = sphi %s505_s0, %s725_s0   ;;  %s464_s18 = sphi %s503_s18, %s727_s18   ;;  %s460_s17 = sphi %s501_s17, %s726_s17  }
  0x13   : > { %s343_s21 = sadd.s32 4294967294, %s472_s19   ;;  %s526_s22 = sadd.s32 1, %s472_s19  }
  0x14   : > { %718 = sst [smem:[#allocation9_spill]] %s526_s22  ;;  %s71_s23 = sadd.s32 1, %s468_s0 }
  0x15   : > { %s68_s24 = ssub.s32 %s472_s19, %s526_s22  ;;  %p81_p5 = scmp.ne.s32.totalorder %s468_s0, %s464_s18 }
  0x16   : > { %p69_p6 = scmp.eq.s32.totalorder %s68_s24, 0  ;;  %p82_p7 = scmp.eq.s32.totalorder %s522_s20, 1 }
  0x17   : > { %p87_p8 = scmp.ne.s32.totalorder %s464_s18, %s460_s17  ;;  %p88_p9 = scmp.eq.s32.totalorder %s343_s21, 1 }
  0x18   : > { %s537_s25 = scalar_select %p69_p6, %s468_s0, %s71_s23  }
  0x19   : > { %p539_p10 = por %p82_p7, %p81_p5  ;;  %p543_p11 = por %p88_p9, %p87_p8 }
  0x1a   : > { %719 = sst [smem:[#allocation10_spill]] %s537_s25  ;;  %p345_p12 = scmp.ge.s32.totalorder %s472_s19, 1 }
  0x1b   : > { %p112_p13 = scmp.lt.s32.totalorder %s472_s19, 3 }
  0x1d   : > { %p113_p0 = pnand %p345_p12, %p112_p13 }
  0x1e   : > { %s714_s28 = sand.u32 (!%p113_p0), 1, %s464_s18   ;;  %s551_s29 = sshll.u32 (!%p113_p0), %s522_s20, 7  ;;  %vm235_vm0 = vcmask (!%p113_p0), 1040384   ;;  %vm237_vm1 = vcmask (!%p113_p0), 1041408   ;;  %vm239_vm2 = vcmask (!%p113_p0), 1042432   ;;  %vm241_vm3 = vcmask (!%p113_p0), 1043456  }
  0x1f   : > { %116 = sbr.rel (%p113_p0) target bundleno = 82 (0x52), region = 28  ;;  %s130_s30 = sld [smem:[#allocation3 + %s551_s29]] (!%p113_p0)  ;;  %vm243_vm4 = vcmask (!%p113_p0), 1044480   ;;  %vm245_vm5 = vcmask (!%p113_p0), 1045504   ;;  %vm247_vm6 = vcmask (!%p113_p0), 1046528   ;;  %v256_v20 = vld [vmem:[%s711_s2] sm:$0xff] (!%p113_p0) }
  0x20   : > { %s556_s4 = sshll.u32 (!%p113_p0), %s714_s28, 4  ;;  %s133_s5 = sadd.s32 (!%p113_p0), 1, %s551_s29  ;;  %vm260_vm7 = vcmask (!%p113_p0), 523264   ;;  %v257_v45 = vld [vmem:[%s711_s2 + $0x8] sm:$0xff] (!%p113_p0) }
  0x21   : > { %s134_s6 = sld [smem:[#allocation3 + %s133_s5]] (!%p113_p0)  ;;  %s137_s7 = sadd.s32 (!%p113_p0), 2, %s551_s29 }
  0x22   : > { %s138_s8 = sld [smem:[#allocation3 + %s137_s7]] (!%p113_p0)  ;;  %s141_s9 = sadd.s32 (!%p113_p0), 3, %s551_s29 }
  0x23   : > { %s142_s10 = sld [smem:[#allocation3 + %s141_s9]] (!%p113_p0)  ;;  %s145_s11 = sadd.s32 (!%p113_p0), 4, %s551_s29 }
  0x24   : > { %s146_s12 = sld [smem:[#allocation3 + %s145_s11]] (!%p113_p0)  ;;  %s149_s13 = sadd.s32 (!%p113_p0), 5, %s551_s29 }
  0x25   : > { %s131_s16 = scalar_lea.vmem (!%p113_p0), %s710_s1, %s130_s30  ;;  %s150_s21 = sld [smem:[#allocation3 + %s149_s13]] (!%p113_p0) }
  0x26   : > { %s153_s23 = sadd.s32 6, %s551_s29  ;;  %s157_s24 = sadd.s32 7, %s551_s29  ;;  %v132_v0 = vld [vmem:[%s131_s16] sm:$0x1] }
  0x27   : > { %s135_s28 = scalar_lea.vmem %s710_s1, %s134_s6  ;;  %s571_s22 = sld [smem:[#allocation3 + %s153_s23]] }
  0x28   : > { %v136_v1 = vld [vmem:[%s135_s28] sm:$0x1]  ;;  %s139_s9 = scalar_lea.vmem %s710_s1, %s138_s8  ;;  %s576_s11 = sld [smem:[#allocation3 + %s157_s24]] }
  0x29   : > { %v140_v2 = vld [vmem:[%s139_s9] sm:$0x1]  ;;  %s143_s14 = scalar_lea.vmem %s710_s1, %s142_s10  ;;  %v194_v3 = vrot.slane %v136_v1, 7  ;;  %s161_s10 = sadd.s32 8, %s551_s29 }
  0x2a   : > { %v144_v4 = vld [vmem:[%s143_s14] sm:$0x1]  ;;  %s147_s28 = scalar_lea.vmem %s710_s1, %s146_s12  ;;  %v197_v5 = vrot.slane %v140_v2, 6  ;;  %s165_s12 = sadd.s32 9, %s551_s29 }
  0x2b   : > { %v148_v6 = vld [vmem:[%s147_s28] sm:$0x1]  ;;  %s151_s15 = scalar_lea.vmem %s710_s1, %s150_s21  ;;  %v200_v7 = vrot.slane %v144_v4, 5  ;;  %v236_v8 = vsel %vm235_vm0, %v132_v0, %v194_v3  ;;  %s596_s21 = sld [smem:[#allocation3 + %s161_s10]] }
  0x2c   : > { %v152_v9 = vld [vmem:[%s151_s15] sm:$0x1]  ;;  %v203_v10 = vrot.slane %v148_v6, 4  ;;  %v238_v11 = vsel %vm237_vm1, %v236_v8, %v197_v5  ;;  %s166_s30 = sld [smem:[#allocation3 + %s165_s12]]  ;;  %s173_s13 = sadd.s32 11, %s551_s29 }
  0x2d   : > { %s155_s24 = scalar_lea.vmem %s710_s1, %s571_s22  ;;  %v206_v12 = vrot.slane %v152_v9, 3  ;;  %v240_v13 = vsel %vm239_vm2, %v238_v11, %v200_v7  ;;  %s169_s22 = sadd.s32 10, %s551_s29 }
  0x2e   : > { %v156_v14 = vld [vmem:[%s155_s24] sm:$0x1]  ;;  %s159_s9 = scalar_lea.vmem %s710_s1, %s576_s11  ;;  %v242_v15 = vsel %vm241_vm3, %v240_v13, %v203_v10  ;;  %s170_s11 = sld [smem:[#allocation3 + %s169_s22]] }
  0x2f   : > { %v160_v16 = vld [vmem:[%s159_s9] sm:$0x1]  ;;  %v209_v17 = vrot.slane %v156_v14, 2  ;;  %v244_v18 = vsel %vm243_vm4, %v242_v15, %v206_v12  ;;  %s174_s25 = sld [smem:[#allocation3 + %s173_s13]]  ;;  %s177_s28 = sadd.s32 12, %s551_s29 }
  0x30   : > { %v212_v19 = vrot.slane %v160_v16, 1  ;;  %s181_s6 = sadd.s32 13, %s551_s29  ;;  %s178_s8 = sld [smem:[#allocation3 + %s177_s28]] }
  0x31   : > { %v246_v21 = vsel %vm245_vm5, %v244_v18, %v209_v17  ;;  %s182_s15 = sld [smem:[#allocation3 + %s181_s6]]  ;;  %s163_s16 = scalar_lea.vmem %s710_s1, %s596_s21 }
  0x32   : > { %v248_v22 = vsel %vm247_vm6, %v246_v21, %v212_v19  ;;  %s185_s23 = sadd.s32 14, %s551_s29  ;;  %s167_s7 = scalar_lea.vmem %s710_s1, %s166_s30  ;;  %v164_v24 = vld [vmem:[%s163_s16] sm:$0x1] }
  0x33   : > { %v258_v23 = vadd.f32 %v256_v20, %v248_v22  ;;  %s186_s9 = sld [smem:[#allocation3 + %s185_s23]]  ;;  %s622_s22 = scalar_lea.vmem [#allocation4], %s556_s4  ;;  %v168_v25 = vld [vmem:[%s167_s7] sm:$0x1] }
  0x34   : > { %s189_s13 = sadd.s32 15, %s551_s29  ;;  %s171_s28 = scalar_lea.vmem %s710_s1, %s170_s11  ;;  %v215_v26 = vrot.slane %v168_v25, 7 }
  0x35   : > { %261 = vst.msk [vmem:[%s622_s22] sm:$0xff] %vm260_vm7, %v258_v23  ;;  %s175_s10 = scalar_lea.vmem %s710_s1, %s174_s25  ;;  %v172_v27 = vld [vmem:[%s171_s28] sm:$0x1]  ;;  %s190_s30 = sld [smem:[#allocation3 + %s189_s13]] }
  0x36   : > { %v176_v28 = vld [vmem:[%s175_s10] sm:$0x1]  ;;  %s179_s23 = scalar_lea.vmem %s710_s1, %s178_s8  ;;  %v218_v29 = vrot.slane %v172_v27, 6  ;;  %v249_v31 = vsel %vm235_vm0, %v164_v24, %v215_v26  ;;  %s353_s13 = sshll.u32 %s522_s20, 8 }
  0x37   : > { %s183_s29 = scalar_lea.vmem %s710_s1, %s182_s15  ;;  %v221_v30 = vrot.slane %v176_v28, 5  ;;  %v180_v32 = vld [vmem:[%s179_s23] sm:$0x1]  ;;  %s662_s21 = scalar_lea.hbm %s712_s3, %s353_s13 }
  0x38   : > { %v184_v33 = vld [vmem:[%s183_s29] sm:$0x1]  ;;  %v224_v34 = vrot.slane %v180_v32, 4  ;;  %v250_v36 = vsel %vm237_vm1, %v249_v31, %v218_v29  ;;  %s722_s20 = sand.u32 1, %s464_s18   ;;  %s475_s4 = smov [#allocation4]  }
  0x39   : > { %s187_s5 = scalar_lea.vmem %s710_s1, %s186_s9  ;;  %v227_v35 = vrot.slane %v184_v33, 3  ;;  %v251_v38 = vsel %vm239_vm2, %v250_v36, %v221_v30  ;;  %s277_s9 = sshll.u32 %s622_s22, 4  ;;  %s656_s9 = int_to_ptr.vmem [resolvable:$true] %s277_s9 }
  0x3a   : > { %v188_v37 = vld [vmem:[%s187_s5] sm:$0x1]  ;;  %v252_v40 = vsel %vm241_vm3, %v251_v38, %v224_v34  ;;  %s668_s10 = scalar_lea.sflag [#allocation5], %s722_s20  ;;  %s412_s12 = sshll.u32 %s475_s4, 4  ;;  %s413_s12 = int_to_ptr.vmem [resolvable:$false] %s412_s12 }
  0x3b   : > { %v230_v39 = vrot.slane %v188_v37, 2  ;;  %s191_s7 = scalar_lea.vmem %s710_s1, %s190_s30  ;;  %v253_v41 = vsel %vm243_vm4, %v252_v40, %v227_v35  ;;  %s408_s30 = scalar_lea.vmem %s656_s9, 256 }
  0x3c   : > { %v192_v42 = vld [vmem:[%s191_s7] sm:$0x1]  ;;  %p409_p1 = scmp.ne.s32.totalorder %s656_s9, %s408_s30  ;;  %s414_s23 = scalar_lea.vmem %s413_s12, 512 }
  0x3d   : > { %v254_v43 = vsel %vm245_vm5, %v253_v41, %v230_v39  ;;  %v233_v44 = vrot.slane %v192_v42, 1  ;;  %p415_p4 = scmp.lt.s32.totalorder %s656_s9, %s413_s12  ;;  %p416_p5 = scmp.lt.s32.totalorder %s414_s23, %s408_s30 }
  0x3e   : > { %p410_p2 = pnand %p409_p1, %p539_p10 }
  0x3f   : > { %v255_v46 = vsel %vm247_vm6, %v254_v43, %v233_v44  ;;  %p417_p6 = por %p416_p5, %p415_p4 }
  0x40   : > { %v259_v47 = vadd.f32 %v257_v45, %v255_v46  ;;  %p411_p3 = pneg %p410_p2 }
  0x42   : > { %262 = vst.msk [vmem:[%s622_s22 + $0x8] sm:$0xff] %vm260_vm7, %v259_v47  ;;  %p418_p7 = pnand %p417_p6, %p411_p3 }
  0x44   : > { %421 = shalt.err (!%p418_p7)
}
  0x45   : > { %s422_s22 = scalar_lea.hbm %s662_s21, 256  ;;  %s426_s29 = scalar_lea.hbm %s712_s3, 512 }
  0x46   : > { %p423_p8 = scmp.ne.s32.totalorder %s662_s21, %s422_s22  ;;  %p427_p13 = scmp.lt.u32.totalorder %s662_s21, %s712_s3 }
  0x47   : > { %p428_p0 = scmp.lt.u32.totalorder %s426_s29, %s422_s22  ;;  %p430_p2 = scmp.lt.u32.totalorder %s422_s22, %s662_s21 }
  0x48   : > { %p424_p9 = pnand %p423_p8, %p539_p10 }
  0x49   : > { %p429_p1 = por %p428_p0, %p427_p13 }
  0x4a   : > { %p425_p12 = pneg %p424_p9 }
  0x4b   : > { %p431_p3 = por %p430_p2, %p429_p1 }
  0x4d   : > { %p432_p4 = pnand %p431_p3, %p425_p12 }
  0x4f   : > { %435 = shalt.err (!%p432_p4)
}
  0x50   : > { %s476_s5 = smov 128   ;;  %s477_s8 = smov 8  }
  0x51   : > { %354 = dma.vmem_to_hbm [thread:$0]  (%p539_p10), %s656_s9, 256, %s662_s21, %s668_s10, %s476_s5, %s476_s5, %s477_s8  }
  0x52 PF: > { %p360_p5 = scmp.ge.s32.totalorder %s472_s19, 2  ;;  %s292_s15 = sand.u32 1, %s460_s17  }
  0x53   : > { %s293_s7 = scalar_lea.sflag [#allocation5], %s292_s15 }
  0x54   : > { %p357_p6 = pnand %p360_p5, %p543_p11 }
  0x56   : > { %455 = dma.done.wait (!%p357_p6), %s293_s7, 256  }
  0x57   : > { %457 = vsyncadd (!%p357_p6), %s293_s7, 4294967040  ;;  %s723_s19 = sld [smem:[#allocation9_spill]]  ;;  %s724_s13 = sld [smem:[#allocation8_spill]] }
  0x58   : > { %s725_s0 = sld [smem:[#allocation10_spill]]  ;;  %s726_s17 = smov %s464_s18 }
  0x5d   : > { %p19_p7 = scmp.ge.s32.totalorder %s723_s19, 4   ;;  %s727_s18 = smov %s724_s13 }
  0x5f   :  { %21 = sbr.rel (!%p19_p7) target bundleno = 18 (0x12), region = 76 }
  0x66   :  { %298 = vsyncpa [#allocation5], 1 }
  0x67   :  { %300 = vsyncpa [#allocation5 + $0x1], 1 }

</bundles_post_ra>
